<compile_context>
chip_gen: v7x
topology: tpu7x:2x2x1
jax: 0.10.0
libtpu: 0.0.40
codegen_flags: <defaults>
</compile_context>

<pallas_src>
import functools

import jax
import jax.numpy as jnp
from jax.experimental import pallas as pl
from jax.experimental.pallas import tpu as pltpu

LANE = 128        # TPU lane width (last dim)
SUBLANE = 8       # TPU sublane width (second-last dim, f32)
TM_MAX = 2048     # max row-tile size (VMEM per tile is tiny at this width)
GRID_TARGET = 4   # aim for >= 4 grid steps so both v7x TensorCores get work


def _cdiv(a: int, b: int) -> int:
    return -(-a // b)


def _round_up(x: int, m: int) -> int:
    return (x + m - 1) // m * m


def _pick_row_tile(B: int) -> int:
    """Row tile: big enough to amortize grid-step overhead, small enough that
    large batches still split into >= GRID_TARGET steps (megacore)."""
    t = _round_up(max(1, _cdiv(B, GRID_TARGET)), SUBLANE)
    t = min(TM_MAX, t)
    if t >= B:
        # Single full-extent block (second-to-last dim == full array dim is
        # always a legal block shape, and avoids any ragged block).
        return B
    return t


def _pad2(w, rows: int, cols: int):
    """Zero-pad a 2-D array to (rows, cols) (identity if already that shape)."""
    if w.shape == (rows, cols):
        return w
    return jnp.zeros((rows, cols), w.dtype).at[:w.shape[0], :w.shape[1]].set(w)


def _make_mlp_kernel(n_hidden_layers: int):
    """Fused-MLP kernel body for a fixed (trace-time) layer count."""

    def kernel(*refs):
        # refs = [x, w_in, b_in, (w_h, b_h)*n, w_out, b_out, out]
        x_ref = refs[0]
        o_ref = refs[-1]
        idx = 1

        def dense(h, w_ref, b_ref):
            # MXU matmul in the weights' dtype, f32 accumulation; bias on VPU.
            y = jnp.dot(h.astype(w_ref.dtype), w_ref[...],
                        preferred_element_type=jnp.float32)
            return y + b_ref[...]

        # fc_in + ReLU
        h = jnp.maximum(dense(x_ref[...], refs[idx], refs[idx + 1]), 0.0)
        idx += 2

        # hidden Linear + ReLU stack (unrolled at trace time)
        for _ in range(n_hidden_layers):
            h = jnp.maximum(dense(h, refs[idx], refs[idx + 1]), 0.0)
            idx += 2

        # fc_out (no activation)
        y = dense(h, refs[idx], refs[idx + 1])
        o_ref[...] = y.astype(o_ref.dtype)

    return kernel


def mlp_point_encoder_forward(x, params, n_hidden_layers: int,
                              *, compute_dtype=jnp.float32):
    """Pallas forward pass of MLPPointEncoder.

    Args:
      x: (B, D, T) float input (flattened to (B, D*T) like the PyTorch code).
      params: dict with
        'w_in'  (in_dim*11, hidden)   'b_in'  (1, hidden)
        'w_h'   list of (hidden, hidden), 'b_h' list of (1, hidden)
        'w_out' (hidden, out_dim)     'b_out' (1, out_dim)
        (weights stored pre-transposed: y = x @ W + b).
      n_hidden_layers: static number of hidden layers.
      compute_dtype: dtype of the matmul operands (f32 for exactness, bf16 for
        the MXU's native single-pass path). Accumulation is always f32.
    Returns:
      (B, out_dim) float32 output.
    """
    B, D, T = x.shape
    K = D * T
    hidden = params['w_in'].shape[1]
    out_dim = params['w_out'].shape[1]

    # Only the hidden dim is padded (lane-dense intermediates; weights tiny).
    H_pad = _round_up(hidden, LANE)

    tm = _pick_row_tile(B)
    grid = (_cdiv(B, tm),)

    # Flatten (free, bitcast-compatible reshape). No batch / feature padding.
    x2d = x.reshape(B, K)

    def _w(w):  # weight -> compute dtype (one-time, few KiB)
        return w.astype(compute_dtype)

    def _b(b, cols):  # bias stays f32 (added to the f32 accumulator)
        return _pad2(b, 1, cols).astype(jnp.float32)

    operands = [x2d,
                _w(_pad2(params['w_in'], K, H_pad)),
                _b(params['b_in'], H_pad)]
    for i in range(n_hidden_layers):
        operands += [_w(_pad2(params['w_h'][i], H_pad, H_pad)),
                     _b(params['b_h'][i], H_pad)]
    operands += [_w(_pad2(params['w_out'], H_pad, out_dim)),
                 _b(params['b_out'], out_dim)]

    # BlockSpecs (helpers capture nothing; no late-binding closures).
    def _row_spec(shape):
        return pl.BlockSpec(shape, lambda i: (i, 0))

    def _const_spec(shape):
        return pl.BlockSpec(shape, lambda i: (0, 0))

    in_specs = [_row_spec((tm, K))]
    in_specs += [_const_spec(op.shape) for op in operands[1:]]
    out_spec = _row_spec((tm, out_dim))

    # Advisory cost estimate (unpadded counts) so XLA overlaps this short call.
    flops = 2 * B * (K * hidden
                     + n_hidden_layers * hidden * hidden
                     + hidden * out_dim)
    weight_bytes = sum(int(op.size) * op.dtype.itemsize for op in operands[1:])
    bytes_accessed = int(B * K * x2d.dtype.itemsize
                         + B * out_dim * 4
                         + weight_bytes)
    cost = pl.CostEstimate(flops=int(flops), transcendentals=0,
                           bytes_accessed=bytes_accessed)

    kernel = _make_mlp_kernel(n_hidden_layers)

    out = pl.pallas_call(
        kernel,
        out_shape=jax.ShapeDtypeStruct((B, out_dim), jnp.float32),
        grid=grid,
        in_specs=in_specs,
        out_specs=out_spec,
        compiler_params=pltpu.CompilerParams(
            dimension_semantics=("parallel",)),
        cost_estimate=cost,
    )(*operands)

    return out


def init_params(key, in_dim, hidden_dim, out_dim, n_hidden_layers):
    """Deterministic synthetic init (PyTorch-Linear-style uniform fan-in)."""
    def linear(k, fan_in, fan_out):
        k1, k2 = jax.random.split(k)
        bound = 1.0 / jnp.sqrt(fan_in)
        # stored pre-transposed: (fan_in, fan_out)
        w = jax.random.uniform(k1, (fan_in, fan_out), jnp.float32, -bound, bound)
        b = jax.random.uniform(k2, (1, fan_out), jnp.float32, -bound, bound)
        return w, b

    full_in = in_dim * 11
    keys = jax.random.split(key, 2 + n_hidden_layers)
    w_in, b_in = linear(keys[0], full_in, hidden_dim)
    w_h, b_h = [], []
    for i in range(n_hidden_layers):
        w, b = linear(keys[1 + i], hidden_dim, hidden_dim)
        w_h.append(w)
        b_h.append(b)
    w_out, b_out = linear(keys[-1], hidden_dim, out_dim)
    return {'w_in': w_in, 'b_in': b_in, 'w_h': w_h, 'b_h': b_h,
            'w_out': w_out, 'b_out': b_out}


def reference_forward(x, params, n_hidden_layers):
    """Pure-JAX reference mirroring the PyTorch module."""
    B, D, T = x.shape
    h = x.reshape(B, D * T)
    h = jnp.maximum(h @ params['w_in'] + params['b_in'], 0.0)
    for i in range(n_hidden_layers):
        h = jnp.maximum(h @ params['w_h'][i] + params['b_h'][i], 0.0)
    return h @ params['w_out'] + params['b_out']


if __name__ == "__main__":
    # config: in_dim=4 -> flattened in_dim*11 = 44, hidden_dim=32, out_dim=16,
    # n_hidden_layers=2.  Input (B, D, T) with D*T == in_dim*11 => D=4, T=11.
    config = dict(in_dim=4, hidden_dim=32, out_dim=16, n_hidden_layers=2)
    B, D, T = 2, config['in_dim'], 11

    key = jax.random.PRNGKey(0)
    kx, kp = jax.random.split(key)
    x = jax.random.normal(kx, (B, D, T), dtype=jnp.float32)
    params = init_params(kp, config['in_dim'], config['hidden_dim'],
                         config['out_dim'], config['n_hidden_layers'])

    ref = reference_forward(x, params, config['n_hidden_layers'])

    # Exact path: f32 matmul operands, bit-faithful to the reference math.
    fwd_f32 = jax.jit(functools.partial(
        mlp_point_encoder_forward,
        n_hidden_layers=config['n_hidden_layers'],
        compute_dtype=jnp.float32))
    out_f32 = jax.block_until_ready(fwd_f32(x, params))
    assert out_f32.shape == (B, config['out_dim'])
    assert jnp.allclose(out_f32, ref, atol=1e-4, rtol=1e-4), \
        "f32 mismatch vs reference"

    # Perf path: bf16 matmul operands, f32 accumulation (looser tolerance).
    fwd_bf16 = jax.jit(functools.partial(
        mlp_point_encoder_forward,
        n_hidden_layers=config['n_hidden_layers'],
        compute_dtype=jnp.bfloat16))
    out_bf16 = jax.block_until_ready(fwd_bf16(x, params))
    assert out_bf16.shape == (B, config['out_dim'])
    assert jnp.allclose(out_bf16, ref, atol=3e-2, rtol=3e-2), \
        "bf16 mismatch vs reference"

    print("KERNEL_OK")
</pallas_src>

<mosaic_0001>
module attributes {stable_mosaic.version = 11 : i64} {
  func.func @kernel(%arg0: i32, %arg1: memref<2x44xf32, #tpu.memory_space<vmem>>, %arg2: memref<44x128xf32, #tpu.memory_space<vmem>>, %arg3: memref<1x128xf32, #tpu.memory_space<vmem>>, %arg4: memref<128x128xf32, #tpu.memory_space<vmem>>, %arg5: memref<1x128xf32, #tpu.memory_space<vmem>>, %arg6: memref<128x128xf32, #tpu.memory_space<vmem>>, %arg7: memref<1x128xf32, #tpu.memory_space<vmem>>, %arg8: memref<128x16xf32, #tpu.memory_space<vmem>>, %arg9: memref<1x16xf32, #tpu.memory_space<vmem>>, %arg10: memref<2x16xf32, #tpu.memory_space<vmem>>) attributes {dimension_semantics = [#tpu.dimension_semantics<parallel>], iteration_bounds = array<i64: 1>, scalar_prefetch = 0 : i64, scratch_operands = 0 : i64, tpu.core_type = #tpu.core_type<tc>, window_params = [{transform_indices = @transform_0, window_bounds = array<i64: 2, 44>}, {pipeline_mode = #tpu.pipeline_mode<synchronous>, transform_indices = @transform_1, window_bounds = array<i64: 44, 128>}, {pipeline_mode = #tpu.pipeline_mode<synchronous>, transform_indices = @transform_2, window_bounds = array<i64: 1, 128>}, {pipeline_mode = #tpu.pipeline_mode<synchronous>, transform_indices = @transform_3, window_bounds = array<i64: 128, 128>}, {pipeline_mode = #tpu.pipeline_mode<synchronous>, transform_indices = @transform_4, window_bounds = array<i64: 1, 128>}, {pipeline_mode = #tpu.pipeline_mode<synchronous>, transform_indices = @transform_5, window_bounds = array<i64: 128, 128>}, {pipeline_mode = #tpu.pipeline_mode<synchronous>, transform_indices = @transform_6, window_bounds = array<i64: 1, 128>}, {pipeline_mode = #tpu.pipeline_mode<synchronous>, transform_indices = @transform_7, window_bounds = array<i64: 128, 16>}, {pipeline_mode = #tpu.pipeline_mode<synchronous>, transform_indices = @transform_8, window_bounds = array<i64: 1, 16>}, {transform_indices = @transform_9, window_bounds = array<i64: 2, 16>}]} {
    %c0 = arith.constant 0 : index
    %c0_0 = arith.constant 0 : index
    %0 = vector.load %arg1[%c0, %c0_0] : memref<2x44xf32, #tpu.memory_space<vmem>>, vector<2x44xf32>
    %c0_1 = arith.constant 0 : index
    %c0_2 = arith.constant 0 : index
    %1 = vector.load %arg2[%c0_1, %c0_2] : memref<44x128xf32, #tpu.memory_space<vmem>>, vector<44x128xf32>
    %cst = arith.constant dense<0.000000e+00> : vector<2x128xf32>
    %2 = tpu.matmul %0, %1, %cst {dimension_numbers = #tpu.dot_dimension_numbers<[1], [0], [0], [1], [0, 0, 1, 1], [], []>} : vector<2x44xf32>, vector<44x128xf32>, vector<2x128xf32> -> vector<2x128xf32>
    %c0_3 = arith.constant 0 : index
    %c0_4 = arith.constant 0 : index
    %3 = vector.load %arg3[%c0_3, %c0_4] : memref<1x128xf32, #tpu.memory_space<vmem>>, vector<1x128xf32>
    %4 = vector.broadcast %3 : vector<1x128xf32> to vector<2x128xf32>
    %5 = arith.addf %2, %4 : vector<2x128xf32>
    %cst_5 = arith.constant 0.000000e+00 : f32
    %6 = vector.broadcast %cst_5 : f32 to vector<2x128xf32>
    %7 = arith.maximumf %5, %6 : vector<2x128xf32>
    %c0_6 = arith.constant 0 : index
    %c0_7 = arith.constant 0 : index
    %8 = vector.load %arg4[%c0_6, %c0_7] : memref<128x128xf32, #tpu.memory_space<vmem>>, vector<128x128xf32>
    %cst_8 = arith.constant dense<0.000000e+00> : vector<2x128xf32>
    %9 = tpu.matmul %7, %8, %cst_8 {dimension_numbers = #tpu.dot_dimension_numbers<[1], [0], [0], [1], [0, 0, 1, 1], [], []>} : vector<2x128xf32>, vector<128x128xf32>, vector<2x128xf32> -> vector<2x128xf32>
    %c0_9 = arith.constant 0 : index
    %c0_10 = arith.constant 0 : index
    %10 = vector.load %arg5[%c0_9, %c0_10] : memref<1x128xf32, #tpu.memory_space<vmem>>, vector<1x128xf32>
    %11 = vector.broadcast %10 : vector<1x128xf32> to vector<2x128xf32>
    %12 = arith.addf %9, %11 : vector<2x128xf32>
    %cst_11 = arith.constant 0.000000e+00 : f32
    %13 = vector.broadcast %cst_11 : f32 to vector<2x128xf32>
    %14 = arith.maximumf %12, %13 : vector<2x128xf32>
    %c0_12 = arith.constant 0 : index
    %c0_13 = arith.constant 0 : index
    %15 = vector.load %arg6[%c0_12, %c0_13] : memref<128x128xf32, #tpu.memory_space<vmem>>, vector<128x128xf32>
    %cst_14 = arith.constant dense<0.000000e+00> : vector<2x128xf32>
    %16 = tpu.matmul %14, %15, %cst_14 {dimension_numbers = #tpu.dot_dimension_numbers<[1], [0], [0], [1], [0, 0, 1, 1], [], []>} : vector<2x128xf32>, vector<128x128xf32>, vector<2x128xf32> -> vector<2x128xf32>
    %c0_15 = arith.constant 0 : index
    %c0_16 = arith.constant 0 : index
    %17 = vector.load %arg7[%c0_15, %c0_16] : memref<1x128xf32, #tpu.memory_space<vmem>>, vector<1x128xf32>
    %18 = vector.broadcast %17 : vector<1x128xf32> to vector<2x128xf32>
    %19 = arith.addf %16, %18 : vector<2x128xf32>
    %cst_17 = arith.constant 0.000000e+00 : f32
    %20 = vector.broadcast %cst_17 : f32 to vector<2x128xf32>
    %21 = arith.maximumf %19, %20 : vector<2x128xf32>
    %c0_18 = arith.constant 0 : index
    %c0_19 = arith.constant 0 : index
    %22 = vector.load %arg8[%c0_18, %c0_19] : memref<128x16xf32, #tpu.memory_space<vmem>>, vector<128x16xf32>
    %cst_20 = arith.constant dense<0.000000e+00> : vector<2x16xf32>
    %23 = tpu.matmul %21, %22, %cst_20 {dimension_numbers = #tpu.dot_dimension_numbers<[1], [0], [0], [1], [0, 0, 1, 1], [], []>} : vector<2x128xf32>, vector<128x16xf32>, vector<2x16xf32> -> vector<2x16xf32>
    %c0_21 = arith.constant 0 : index
    %c0_22 = arith.constant 0 : index
    %24 = vector.load %arg9[%c0_21, %c0_22] : memref<1x16xf32, #tpu.memory_space<vmem>>, vector<1x16xf32>
    %25 = vector.broadcast %24 : vector<1x16xf32> to vector<2x16xf32>
    %26 = arith.addf %23, %25 : vector<2x16xf32>
    %c0_23 = arith.constant 0 : index
    %c0_24 = arith.constant 0 : index
    %27 = vector.load %arg10[%c0_23, %c0_24] : memref<2x16xf32, #tpu.memory_space<vmem>>, vector<2x16xf32>
    tpu.vector_store %arg10[%c0_23, %c0_24], %26 {strides = array<i32>} : memref<2x16xf32, #tpu.memory_space<vmem>>, vector<2x16xf32>,
    return
  }
  func.func @transform_0(%arg0: i32) -> (i32, i32) {
    %c0_i32 = arith.constant 0 : i32
    %c0_i32_0 = arith.constant 0 : i32
    return %arg0, %c0_i32 : i32, i32
  }
  func.func @transform_1(%arg0: i32) -> (i32, i32) {
    %c0_i32 = arith.constant 0 : i32
    %c0_i32_0 = arith.constant 0 : i32
    %c0_i32_1 = arith.constant 0 : i32
    return %c0_i32, %c0_i32_0 : i32, i32
  }
  func.func @transform_2(%arg0: i32) -> (i32, i32) {
    %c0_i32 = arith.constant 0 : i32
    %c0_i32_0 = arith.constant 0 : i32
    %c0_i32_1 = arith.constant 0 : i32
    return %c0_i32, %c0_i32_0 : i32, i32
  }
  func.func @transform_3(%arg0: i32) -> (i32, i32) {
    %c0_i32 = arith.constant 0 : i32
    %c0_i32_0 = arith.constant 0 : i32
    %c0_i32_1 = arith.constant 0 : i32
    return %c0_i32, %c0_i32_0 : i32, i32
  }
  func.func @transform_4(%arg0: i32) -> (i32, i32) {
    %c0_i32 = arith.constant 0 : i32
    %c0_i32_0 = arith.constant 0 : i32
    %c0_i32_1 = arith.constant 0 : i32
    return %c0_i32, %c0_i32_0 : i32, i32
  }
  func.func @transform_5(%arg0: i32) -> (i32, i32) {
    %c0_i32 = arith.constant 0 : i32
    %c0_i32_0 = arith.constant 0 : i32
    %c0_i32_1 = arith.constant 0 : i32
    return %c0_i32, %c0_i32_0 : i32, i32
  }
  func.func @transform_6(%arg0: i32) -> (i32, i32) {
    %c0_i32 = arith.constant 0 : i32
    %c0_i32_0 = arith.constant 0 : i32
    %c0_i32_1 = arith.constant 0 : i32
    return %c0_i32, %c0_i32_0 : i32, i32
  }
  func.func @transform_7(%arg0: i32) -> (i32, i32) {
    %c0_i32 = arith.constant 0 : i32
    %c0_i32_0 = arith.constant 0 : i32
    %c0_i32_1 = arith.constant 0 : i32
    return %c0_i32, %c0_i32_0 : i32, i32
  }
  func.func @transform_8(%arg0: i32) -> (i32, i32) {
    %c0_i32 = arith.constant 0 : i32
    %c0_i32_0 = arith.constant 0 : i32
    %c0_i32_1 = arith.constant 0 : i32
    return %c0_i32, %c0_i32_0 : i32, i32
  }
  func.func @transform_9(%arg0: i32) -> (i32, i32) {
    %c0_i32 = arith.constant 0 : i32
    %c0_i32_0 = arith.constant 0 : i32
    return %arg0, %c0_i32 : i32, i32
  }
}

</mosaic_0001>

<bundles_post_ra>
// kernel: mlp_point_encoder_forward.1
= control target key start
LH: loop header
LB: loop body
LE: loop exit
PB: predicated region body
PF: predicated region fallthrough
CT: control target
= control target key end

     0   :  { %v718_v3 = vmov 0.0|0.0   ;;  %vm719_vm0 = vmmov 0   ;;  %v720_v6 = vmov 0.0   ;;  %vm51_vm1 = vcmask 1043456   ;;  %s997_s0 = inlined_call_operand.vmem [shape: f32[2,44], index: 0, kind: input, shape index: {}]   ;;  %s998_s1 = inlined_call_operand.vmem [shape: f32[44,128], index: 1, kind: input, shape index: {}]   ;;  %s999_s2 = inlined_call_operand.vmem [shape: f32[1,128], index: 2, kind: input, shape index: {}]   ;;  %s1000_s3 = inlined_call_operand.vmem [shape: f32[128,128], index: 3, kind: input, shape index: {}]   ;;  %s1001_s4 = inlined_call_operand.vmem [shape: f32[1,128], index: 4, kind: input, shape index: {}]   ;;  %s1002_s5 = inlined_call_operand.vmem [shape: f32[128,128], index: 5, kind: input, shape index: {}]   ;;  %s1003_s6 = inlined_call_operand.vmem [shape: f32[1,128], index: 6, kind: input, shape index: {}]   ;;  %s1004_s7 = inlined_call_operand.vmem [shape: f32[128,16], index: 7, kind: input, shape index: {}]   ;;  %s1005_s8 = inlined_call_operand.vmem [shape: f32[1,16], index: 8, kind: input, shape index: {}]   ;;  %s1006_s9 = inlined_call_operand.hbm [shape: f32[2,16], index: 9, kind: output, shape index: {}]  }
   0x1   :  { %v34_v0 = vld [vmem:[%s998_s1] sm:$0xff]  ;;  %v35_v1 = vld [vmem:[%s998_s1 + $0x8] sm:$0xff]  ;;  %v36_v2 = vld [vmem:[%s998_s1 + $0x10] sm:$0xff]  ;;  %607 = vmatprep.subr.bf16.mxu0 %v718_v3  ;;  %617 = vmatprep.subr.bf16.mxu1 %v718_v3 }
   0x2   :  { %v608_v4 = vpack.c.bf16 %v35_v1, %v34_v0  ;;  %v37_v5 = vld [vmem:[%s998_s1 + $0x18] sm:$0xff]  ;;  %499 = vmatprep.mubr.msk.f32.mxu0 %vm719_vm0, %v720_v6  ;;  %v126_v7 = vld [vmem:[%s1000_s3] sm:$0xff]  ;;  %534 = vmatprep.mubr.msk.f32.mxu1 %vm719_vm0, %v720_v6  ;;  %v127_v9 = vld [vmem:[%s1000_s3 + $0x8] sm:$0xff] }
   0x3   :  { %v611_v8 = vpack.c.bf16 %v37_v5, %v36_v2  ;;  %v128_v10 = vld [vmem:[%s1000_s3 + $0x10] sm:$0xff]  ;;  %v129_v11 = vld [vmem:[%s1000_s3 + $0x18] sm:$0xff]  ;;  %v38_v12 = vld [vmem:[%s998_s1 + $0x20] sm:$0xff]  ;;  %v618_v14 = vpack.c.bf16 %v127_v9, %v126_v7 }
   0x4   :  { %609 = vmatpush3.bf16.msra.mxu0 %v608_v4  ;;  %v39_v13 = vld [vmem:[%s998_s1 + $0x28] sm:$0xf]  ;;  %v621_v15 = vpack.c.bf16 %v129_v11, %v128_v10  ;;  %v130_v17 = vld [vmem:[%s1000_s3 + $0x20] sm:$0xff] }
   0x5   :  { %610 = vmatprep.subr.bf16.mxu0 %v718_v3  ;;  %619 = vmatpush3.bf16.msra.mxu1 %v618_v14  ;;  %v614_v16 = vpack.c.bf16 %v39_v13, %v38_v12  ;;  %v131_v18 = vld [vmem:[%s1000_s3 + $0x28] sm:$0xff] }
   0x6   :  { %620 = vmatprep.subr.bf16.mxu1 %v718_v3 }
   0x8   :  { %612 = vmatpush3.bf16.msra.mxu0 %v611_v8 }
   0x9   :  { %14 = vsyncpa [#allocation3], 0  ;;  %613 = vmatprep.subr.bf16.mxu0 %v718_v3  ;;  %vm721_vm2 = vmmov 1   ;;  %622 = vmatpush3.bf16.msra.mxu1 %v621_v15  ;;  %v624_v19 = vpack.c.bf16 %v131_v18, %v130_v17  ;;  %v33_v20 = vld [vmem:[%s997_s0] sm:$0x3]  ;;  %vm47_vm4 = vcmask 359424  }
   0xa   :  { %vm615_vm3 = vmpackc.low %vm51_vm1, %vm721_vm2  ;;  %623 = vmatprep.subr.bf16.mxu1 %v718_v3  ;;  %v132_v21 = vld [vmem:[%s1000_s3 + $0x30] sm:$0xff]  ;;  %v133_v22 = vld [vmem:[%s1000_s3 + $0x38] sm:$0xff]  ;;  %s722_s27 = smov [#allocation2]   ;;  %vm407_vm5 = vcmask 123904  }
   0xb   :  { %v627_v23 = vpack.c.bf16 %v133_v22, %v132_v21  ;;  %v134_v24 = vld [vmem:[%s1000_s3 + $0x40] sm:$0xff]  ;;  %v135_v25 = vld [vmem:[%s1000_s3 + $0x48] sm:$0xff]  ;;  %v136_v27 = vld [vmem:[%s1000_s3 + $0x50] sm:$0xff]  ;;  %s415_s28 = sshll.u32 %s722_s27, 4  ;;  %s416_s28 = int_to_ptr.vmem [resolvable:$true] %s415_s28 }
   0xc   :  { %616 = vmatpush3.bf16.msk.msra.mxu0 %vm615_vm3, %v614_v16  ;;  %v630_v26 = vpack.c.bf16 %v135_v25, %v134_v24  ;;  %v137_v28 = vld [vmem:[%s1000_s3 + $0x58] sm:$0xff]  ;;  %v138_v30 = vld [vmem:[%s1000_s3 + $0x60] sm:$0xff]  ;;  %v139_v31 = vld [vmem:[%s1000_s3 + $0x68] sm:$0xff]  ;;  %p699_p1 = scmp.lt.s32.totalorder %s416_s28, %s416_s28 }
   0xd   :  { %641 = vmatprep.subr.bf16.mxu0 %v718_v3  ;;  %625 = vmatpush3.bf16.msra.mxu1 %v624_v19  ;;  %v633_v29 = vpack.c.bf16 %v137_v28, %v136_v27  ;;  %v636_v32 = vpack.c.bf16 %v139_v31, %v138_v30  ;;  %v140_v33 = vld [vmem:[%s1000_s3 + $0x70] sm:$0xff]  ;;  %v141_v34 = vld [vmem:[%s1000_s3 + $0x78] sm:$0xff]  ;;  %v220_v36 = vld [vmem:[%s1002_s5] sm:$0xff] }
   0xe   :  { %626 = vmatprep.subr.bf16.mxu1 %v718_v3  ;;  %v639_v35 = vpack.c.bf16 %v141_v34, %v140_v33  ;;  %v221_v37 = vld [vmem:[%s1002_s5 + $0x8] sm:$0xff]  ;;  %v222_v38 = vld [vmem:[%s1002_s5 + $0x10] sm:$0xff]  ;;  %v223_v40 = vld [vmem:[%s1002_s5 + $0x18] sm:$0xff] }
   0xf   :  { %500 = vmatmul.mubr.msk.f32.vlgmr.msra.gmra.mrb[0].mxu0 %vm47_vm4, %v33_v20  ;;  %v642_v39 = vpack.c.bf16 %v221_v37, %v220_v36  ;;  %v645_v41 = vpack.c.bf16 %v223_v40, %v222_v38  ;;  %v224_v42 = vld [vmem:[%s1002_s5 + $0x20] sm:$0xff]  ;;  %v225_v43 = vld [vmem:[%s1002_s5 + $0x28] sm:$0xff]  ;;  %v226_v45 = vld [vmem:[%s1002_s5 + $0x30] sm:$0xff] }
  0x10   :  { %569 = vmatprep.mubr.msk.f32.mxu0 %vm719_vm0, %v720_v6  ;;  %v648_v44 = vpack.c.bf16 %v225_v43, %v224_v42  ;;  %v227_v46 = vld [vmem:[%s1002_s5 + $0x38] sm:$0xff]  ;;  %v228_v48 = vld [vmem:[%s1002_s5 + $0x40] sm:$0xff]  ;;  %v229_v49 = vld [vmem:[%s1002_s5 + $0x48] sm:$0xff] }
  0x11   :  { %628 = vmatpush3.bf16.msra.mxu1 %v627_v23  ;;  %643 = vmatpush3.bf16.msra.mxu0 %v642_v39  ;;  %v651_v47 = vpack.c.bf16 %v227_v46, %v226_v45  ;;  %v654_v50 = vpack.c.bf16 %v229_v49, %v228_v48  ;;  %v230_v51 = vld [vmem:[%s1002_s5 + $0x50] sm:$0xff]  ;;  %v231_v52 = vld [vmem:[%s1002_s5 + $0x58] sm:$0xff]  ;;  %v232_v54 = vld [vmem:[%s1002_s5 + $0x60] sm:$0xff] }
  0x12   :  { %629 = vmatprep.subr.bf16.mxu1 %v718_v3  ;;  %644 = vmatprep.subr.bf16.mxu0 %v718_v3  ;;  %v657_v53 = vpack.c.bf16 %v231_v52, %v230_v51  ;;  %v233_v55 = vld [vmem:[%s1002_s5 + $0x68] sm:$0xff]  ;;  %v423_v57 = vld [vmem:[%s999_s2] ss:$0 sm:$0xff]  ;;  %v234_v62 = vld [vmem:[%s1002_s5 + $0x70] sm:$0xff] }
  0x13   :  { %v660_v56 = vpack.c.bf16 %v233_v55, %v232_v54  ;;  %v235_v63 = vld [vmem:[%s1002_s5 + $0x78] sm:$0xff]  ;;  %v314_v1 = vld [vmem:[%s1004_s7] sm:$0xff]  ;;  %v315_v2 = vld [vmem:[%s1004_s7 + $0x8] sm:$0xff] }
  0x14   :  { %v663_v0 = vpack.c.bf16 %v235_v63, %v234_v62  ;;  %v316_v4 = vld [vmem:[%s1004_s7 + $0x10] sm:$0xff]  ;;  %v666_v5 = vpack.c.bf16 %v315_v2, %v314_v1  ;;  %v318_v8 = vld [vmem:[%s1004_s7 + $0x20] sm:$0xff]  ;;  %v319_v9 = vld [vmem:[%s1004_s7 + $0x28] sm:$0xff] }
  0x15   :  { %631 = vmatpush3.bf16.msra.mxu1 %v630_v26  ;;  %646 = vmatpush3.bf16.msra.mxu0 %v645_v41  ;;  %v672_v10 = vpack.c.bf16 %v319_v9, %v318_v8  ;;  %v320_v11 = vld [vmem:[%s1004_s7 + $0x30] sm:$0xff]  ;;  %v321_v12 = vld [vmem:[%s1004_s7 + $0x38] sm:$0xff]  ;;  %v322_v14 = vld [vmem:[%s1004_s7 + $0x40] sm:$0xff] }
  0x16   :  { %632 = vmatprep.subr.bf16.mxu1 %v718_v3  ;;  %647 = vmatprep.subr.bf16.mxu0 %v718_v3  ;;  %v675_v13 = vpack.c.bf16 %v321_v12, %v320_v11  ;;  %v323_v15 = vld [vmem:[%s1004_s7 + $0x48] sm:$0xff]  ;;  %v324_v17 = vld [vmem:[%s1004_s7 + $0x50] sm:$0xff]  ;;  %v325_v18 = vld [vmem:[%s1004_s7 + $0x58] sm:$0xff] }
  0x17   :  { %v678_v16 = vpack.c.bf16 %v323_v15, %v322_v14  ;;  %v681_v19 = vpack.c.bf16 %v325_v18, %v324_v17  ;;  %v326_v20 = vld [vmem:[%s1004_s7 + $0x60] sm:$0xff]  ;;  %v327_v21 = vld [vmem:[%s1004_s7 + $0x68] sm:$0xff]  ;;  %v328_v28 = vld [vmem:[%s1004_s7 + $0x70] sm:$0xff] }
  0x18   :  { %v684_v22 = vpack.c.bf16 %v327_v21, %v326_v20  ;;  %v426_v23 = vld [vmem:[%s1001_s4] ss:$0 sm:$0xff] }
  0x19   :  { %634 = vmatpush3.bf16.msra.mxu1 %v633_v29  ;;  %649 = vmatpush3.bf16.msra.mxu0 %v648_v44  ;;  %v329_v29 = vld [vmem:[%s1004_s7 + $0x78] sm:$0xff] }
  0x1a   :  { %635 = vmatprep.subr.bf16.mxu1 %v718_v3  ;;  %650 = vmatprep.subr.bf16.mxu0 %v718_v3  ;;  %v687_v30 = vpack.c.bf16 %v329_v29, %v328_v28 }
  0x1d   :  { %637 = vmatpush3.bf16.msra.mxu1 %v636_v32  ;;  %652 = vmatpush3.bf16.msra.mxu0 %v651_v47 }
  0x1e   :  { %638 = vmatprep.subr.bf16.mxu1 %v718_v3  ;;  %653 = vmatprep.subr.bf16.mxu0 %v718_v3 }
  0x21   :  { %640 = vmatpush3.bf16.msra.mxu1 %v639_v35  ;;  %655 = vmatpush3.bf16.msra.mxu0 %v654_v50  ;;  %v428_v35 = vld [vmem:[%s1005_s8] ss:$0 sm:$0xff] }
  0x22   :  { %665 = vmatprep.subr.bf16.mxu1 %v718_v3  ;;  %656 = vmatprep.subr.bf16.mxu0 %v718_v3 }
  0x25   :  { %658 = vmatpush3.bf16.msra.mxu0 %v657_v53 }
  0x26   :  { %659 = vmatprep.subr.bf16.mxu0 %v718_v3 }
  0x29   :  { %661 = vmatpush3.bf16.msra.mxu0 %v660_v56 }
  0x2a   :  { %662 = vmatprep.subr.bf16.mxu0 %v718_v3 }
  0x2d   :  { %664 = vmatpush3.bf16.msra.mxu0 %v663_v0 }
  0xe2   :  { %v121_v58 = vpop.f32.mrb[0].mxu0 }
  0xe3   :  { %v122_v59 = vadd.f32 %v423_v57, %v121_v58  ;;  %v501_v60 = vpop.f32.mrb[1].mxu0 }
  0xe5   :  { %v125_v61 = vmax.f32 %v122_v59, 0.0 }
  0xe7   :  { %535 = vmatmul.mubr.f32.vlgmr.msra.gmra.mrb[0].mxu1 %v125_v61 }
  0xe8   :  { %604 = vmatprep.mubr.msk.f32.mxu1 %vm719_vm0, %v720_v6  ;;  %v317_v6 = vld [vmem:[%s1004_s7 + $0x18] sm:$0xff]  ;;  %667 = vmatpush3.bf16.msra.mxu1 %v666_v5  ;;  %s694_s7 = scalar_lea.vmem %s416_s28, 32 }
  0xe9   :  { %v669_v7 = vpack.c.bf16 %v317_v6, %v316_v4  ;;  %668 = vmatprep.subr.bf16.mxu1 %v718_v3  ;;  %p695_p0 = scmp.ne.s32.totalorder %s416_s28, %s694_s7  ;;  %p700_p2 = scmp.lt.s32.totalorder %s694_s7, %s694_s7 }
  0xeb   :  { %p701_p3 = por %p700_p2, %p699_p1 }
  0xec   :  { %670 = vmatpush3.bf16.msra.mxu1 %v669_v7 }
  0xed   :  { %671 = vmatprep.subr.bf16.mxu1 %v718_v3  ;;  %p702_p4 = pnand %p701_p3, %p695_p0 }
  0xf0   :  { %673 = vmatpush3.bf16.msra.mxu1 %v672_v10 }
  0xf1   :  { %674 = vmatprep.subr.bf16.mxu1 %v718_v3 }
  0xf4   :  { %676 = vmatpush3.bf16.msra.mxu1 %v675_v13 }
  0xf5   :  { %677 = vmatprep.subr.bf16.mxu1 %v718_v3 }
  0xf8   :  { %679 = vmatpush3.bf16.msra.mxu1 %v678_v16 }
  0xf9   :  { %680 = vmatprep.subr.bf16.mxu1 %v718_v3 }
  0xfc   :  { %682 = vmatpush3.bf16.msra.mxu1 %v681_v19 }
  0xfd   :  { %683 = vmatprep.subr.bf16.mxu1 %v718_v3 }
 0x100   :  { %685 = vmatpush3.bf16.msra.mxu1 %v684_v22 }
 0x101   :  { %686 = vmatprep.subr.bf16.mxu1 %v718_v3  ;;  %v427_v3 = vld [vmem:[%s1003_s6] ss:$0 sm:$0xff] }
 0x104   :  { %688 = vmatpush3.bf16.msra.mxu1 %v687_v30 }
 0x1ba   :  { %v215_v24 = vpop.f32.mrb[0].mxu1 }
 0x1bb   :  { %v216_v25 = vadd.f32 %v426_v23, %v215_v24  ;;  %v536_v26 = vpop.f32.mrb[1].mxu1 }
 0x1bd   :  { %v219_v27 = vmax.f32 %v216_v25, 0.0 }
 0x1bf   :  { %570 = vmatmul.mubr.f32.vlgmr.msra.gmra.mrb[2].mxu0 %v219_v27 }
 0x292   :  { %v309_v31 = vpop.f32.mrb[2].mxu0 }
 0x293   :  { %v310_v32 = vadd.f32 %v427_v3, %v309_v31  ;;  %v571_v33 = vpop.f32.mrb[3].mxu0 }
 0x295   :  { %v313_v34 = vmax.f32 %v310_v32, 0.0 }
 0x297   :  { %605 = vmatmul.mubr.f32.vlgmr.msra.gmra.mrb[2].mxu1 %v313_v34 }
 0x36a   :  { %v403_v36 = vpop.f32.mrb[2].mxu1 }
 0x36b   :  { %v404_v37 = vadd.f32 %v428_v35, %v403_v36  ;;  %v606_v38 = vpop.f32.mrb[3].mxu1 }
 0x36d   :  { %408 = vst.msk [vmem:[#allocation2] sm:$0x3] %vm407_vm5, %v404_v37 }
 0x36e   :  { %705 = shalt.err (!%p702_p4)
}
 0x36f   :  { %s706_s30 = scalar_lea.hbm %s1006_s9, 32 }
 0x370   :  { %p707_p5 = scmp.ne.s32.totalorder %s1006_s9, %s706_s30  ;;  %p710_p6 = scmp.lt.u32.totalorder %s706_s30, %s1006_s9 }
 0x372   :  { %p712_p7 = pnand %p710_p6, %p707_p5 }
 0x374   :  { %715 = shalt.err (!%p712_p7)
}
 0x375   :  { %418 = dma.vmem_to_hbm [thread:$0]  %s416_s28, 32, %s1006_s9, [#allocation3]  }
 0x376   :  { %716 = dma.done.wait [#allocation3], 32  }
 0x377   :  { %717 = vsyncadd [#allocation3], 4294967264 }
 0x378   :  { %422 = vsyncpa [#allocation3], 1 }

</bundles_post_ra>
